<compile_context>
chip_gen: v7x
topology: tpu7x:2x2x1
jax: 0.10.0
libtpu: 0.0.40
codegen_flags: <defaults>
</compile_context>

<pallas_src>
import numpy as np
import jax
import jax.numpy as jnp
from jax.experimental import pallas as pl
from jax.experimental.pallas import tpu as pltpu

EOS_ID = 2  # stands in for tokenizer.eos_token_id


# ----------------------------------------------------------------------------
# Kernel 1: v_head (Linear(H, 1, bias=False)) -> rewards [B2, S]
# ----------------------------------------------------------------------------
def _vhead_kernel(h_ref, w_ref, r_ref):
    # h_ref: (bb, tS, H) bf16 hidden-state tile
    # w_ref: (1, 1, H)   bf16 v_head weight (broadcast over bb, tS)
    # r_ref: (bb, tS)    f32 rewards tile (lane-dense along S)
    x = h_ref[...].astype(jnp.float32)          # f32 accumulation path
    w = w_ref[...].astype(jnp.float32)
    # TODO(synk): for very large H this contraction could be pushed onto the
    # MXU (2-D dot); kept on VPU+XLU here because the kernel is HBM-bound and
    # this form lowers robustly for arbitrary (bb, tS, H) tiles.
    r_ref[...] = jnp.sum(x * w, axis=-1)        # (bb, tS)


def _choose_vhead_tiles(B2, S, H, elt_bytes, block_budget_bytes=5 << 20):
    """Pick (bb, tS) satisfying the (8,128) block constraints on in/out specs.

    bb: sublane dim of the output block -> multiple of 8, or full B2.
    tS: lane dim of the output block    -> multiple of 128 dividing S, or S.
    Budget is counted in f32 (the in-kernel working set), not the bf16 DMA size.
    """
    bb = 8 if (B2 % 8 == 0 and B2 >= 8) else B2
    cands = [d for d in range(128, S + 1, 128) if S % d == 0]
    if not cands:
        return bb, S
    fit = [d for d in cands if bb * d * H * 4 <= block_budget_bytes]
    tS = max(fit) if fit else min(cands)
    return bb, tS


def v_head_pallas(hidden_states, w_v, compute_dtype=jnp.bfloat16):
    B2, S, H = hidden_states.shape
    elt = jnp.dtype(compute_dtype).itemsize
    h = hidden_states.astype(compute_dtype)
    w = w_v.reshape(1, 1, H).astype(compute_dtype)

    bb, tS = _choose_vhead_tiles(B2, S, H, elt)
    grid = (B2 // bb, S // tS)

    # VMEM accounting: 2x double-buffered bf16 input block, one f32 working
    # copy, 2x output block, plus the (tiny) weight.  Only override the scoped
    # limit when the default (16 MiB on v5e) might not cover it.
    in_block = bb * tS * H * elt
    needed = 2 * in_block + bb * tS * H * 4 + 2 * bb * tS * 4 + H * elt + (1 << 20)
    cp_kwargs = dict(dimension_semantics=("parallel", "parallel"))
    if needed > (12 << 20):
        cp_kwargs["vmem_limit_bytes"] = int(needed + (4 << 20))

    return pl.pallas_call(
        _vhead_kernel,
        out_shape=jax.ShapeDtypeStruct((B2, S), jnp.float32),
        grid=grid,
        in_specs=[
            pl.BlockSpec((bb, tS, H), lambda b, s: (b, s, 0)),
            pl.BlockSpec((1, 1, H), lambda b, s: (0, 0, 0)),
        ],
        out_specs=pl.BlockSpec((bb, tS), lambda b, s: (b, s)),
        compiler_params=pltpu.CompilerParams(**cp_kwargs),
    )(h, w)


# ----------------------------------------------------------------------------
# Kernel 2: pairwise reward loss + end scores
# ----------------------------------------------------------------------------
def _pairloss_kernel(cid_ref, rid_ref, cr_ref, rr_ref,
                     loss_ref, ce_ref, re_ref, eq_ref):
    cid = cid_ref[...]                             # (tb, S) int32 chosen ids
    rid = rid_ref[...]                             # (tb, S) int32 rejected ids
    cr = cr_ref[...]                               # (tb, S) f32 chosen rewards
    rr = rr_ref[...]                               # (tb, S) f32 rejected rewards
    tb, S = cid.shape

    pos = jax.lax.broadcasted_iota(jnp.int32, (tb, S), 1)
    big = jnp.int32(S)

    # first EOS position (or S if none)
    c_ind = jnp.min(jnp.where(cid == EOS_ID, pos, big), axis=1, keepdims=True)
    r_ind = jnp.min(jnp.where(rid == EOS_ID, pos, big), axis=1, keepdims=True)
    end_ind = jnp.maximum(c_ind, r_ind)

    neq = (cid != rid).astype(jnp.int32)
    div_ind = jnp.min(jnp.where(neq > 0, pos, big), axis=1, keepdims=True)
    all_eq = jnp.max(neq, axis=1, keepdims=True) == 0        # (tb, 1) bool

    # masked mean of -log(sigmoid(chosen - rejected)) over [div_ind, end_ind)
    mask = ((pos >= div_ind) & (pos < end_ind)).astype(jnp.float32)
    diff = cr - rr
    # numerically stable: -log(sigmoid(d)) = softplus(-d)
    #                    = max(-d, 0) + log(1 + exp(-|d|))
    nls = jnp.maximum(-diff, 0.0) + jnp.log(1.0 + jnp.exp(-jnp.abs(diff)))
    cnt = jnp.maximum(jnp.sum(mask, axis=1, keepdims=True), 1.0)  # no div-by-0
    per_loss = jnp.sum(mask * nls, axis=1, keepdims=True) / cnt
    per_loss = jnp.where(all_eq, 0.0, per_loss)               # skipped pairs

    # end scores: chosen uses c_ind-1 in the "inference" (identical-pair) case,
    # otherwise end_ind-1 (== truncated_reward[-1]).
    ce_idx = jnp.where(all_eq, c_ind - 1, end_ind - 1)
    ce = jnp.sum(jnp.where(pos == ce_idx, cr, 0.0), axis=1, keepdims=True)
    re = jnp.sum(jnp.where(pos == (end_ind - 1), rr, 0.0), axis=1, keepdims=True)

    loss_ref[...] = per_loss
    ce_ref[...] = ce
    re_ref[...] = re
    eq_ref[...] = all_eq.astype(jnp.int32)


def _choose_pair_tile(bs, S, block_budget_bytes=4 << 20):
    """Chunk the pair dimension if bs*S grows large; full bs otherwise."""
    if bs % 8 != 0:
        return bs
    row_bytes = S * 4 * 4 * 2          # 4 input arrays, 4B each, double-buffered
    tb = (block_budget_bytes // max(row_bytes, 1)) // 8 * 8
    tb = int(min(max(tb, 8), bs))
    while bs % tb != 0:
        tb -= 8
    return tb


def pairwise_loss_pallas(cid, rid, cr, rr):
    bs, S = cid.shape
    tb = _choose_pair_tile(bs, S)
    grid = (bs // tb,)
    in_spec = pl.BlockSpec((tb, S), lambda i: (i, 0))
    out_spec = pl.BlockSpec((tb, 1), lambda i: (i, 0))
    return pl.pallas_call(
        _pairloss_kernel,
        out_shape=(
            jax.ShapeDtypeStruct((bs, 1), jnp.float32),   # per-pair loss
            jax.ShapeDtypeStruct((bs, 1), jnp.float32),   # chosen end scores
            jax.ShapeDtypeStruct((bs, 1), jnp.float32),   # rejected end scores
            jax.ShapeDtypeStruct((bs, 1), jnp.int32),     # pair-identical flag
        ),
        grid=grid,
        in_specs=[in_spec, in_spec, in_spec, in_spec],
        out_specs=(out_spec, out_spec, out_spec, out_spec),
        compiler_params=pltpu.CompilerParams(dimension_semantics=("parallel",)),
    )(cid, rid, cr, rr)


# ----------------------------------------------------------------------------
# Module forward (glue in plain JAX)
# ----------------------------------------------------------------------------
def gpt_reward_model_lora_forward(input_ids, hidden_states, w_v):
    # TODO(synk): transformer-with-LoRA backbone producing hidden_states is not
    # reproduced; hidden_states stands in for outputs.hidden_states[-1].
    rewards = v_head_pallas(hidden_states, w_v)               # (2*bs, S) f32
    bs = input_ids.shape[0] // 2
    cid, rid = input_ids[:bs], input_ids[bs:]
    cr, rr = rewards[:bs], rewards[bs:]
    per_loss, ce, re, eq = pairwise_loss_pallas(cid, rid, cr, rr)
    loss = jnp.sum(per_loss) / bs
    return {
        "loss": loss,
        "chosen_end_scores": ce[:, 0],
        "rejected_end_scores": re[:, 0],
        "is_equal_pair": eq[:, 0],
        "rewards": rewards,
    }


# ----------------------------------------------------------------------------
# Plain-numpy reference (mirrors the PyTorch forward, non-inference path).
# Uses the same bf16-rounded inputs the kernel consumes so tolerances hold.
# ----------------------------------------------------------------------------
def np_reference(input_ids, hidden, w_v):
    ids = np.asarray(input_ids)
    h = np.asarray(hidden.astype(jnp.bfloat16).astype(jnp.float32))
    w = np.asarray(w_v.astype(jnp.bfloat16).astype(jnp.float32))[0]
    rewards = h @ w                                            # (2bs, S)
    bs = ids.shape[0] // 2
    S = ids.shape[1]
    loss = 0.0
    ce, re_ = [], []
    for i in range(bs):
        c, r = ids[i], ids[bs + i]
        crw, rrw = rewards[i], rewards[bs + i]
        c_inds = np.nonzero(c == EOS_ID)[0]
        c_ind = int(c_inds[0]) if len(c_inds) else S
        r_inds = np.nonzero(r == EOS_ID)[0]
        r_ind = int(r_inds[0]) if len(r_inds) else S
        end_ind = max(c_ind, r_ind)
        div = int(np.nonzero(c != r)[0][0])
        ct, rt = crw[div:end_ind], rrw[div:end_ind]
        ce.append(ct[-1])
        re_.append(rt[-1])
        loss += float(np.mean(np.logaddexp(0.0, -(ct - rt))))  # -log(sigmoid)
    return loss / bs, np.array(ce), np.array(re_), rewards


if __name__ == "__main__":
    bs, S, H = 2, 8, 32
    B2 = 2 * bs

    key = jax.random.PRNGKey(0)
    k1, k2, k3, k4, k5 = jax.random.split(key, 5)

    # deterministic synthetic token ids: shared 3-token prompt, divergent tails,
    # EOS at the last position (so divergence_ind > 0 holds, as asserted in torch).
    prompt = jax.random.randint(k1, (bs, 3), 3, 20, dtype=jnp.int32)
    c_tail = jax.random.randint(k2, (bs, S - 3), 3, 20, dtype=jnp.int32)
    r_tail = jax.random.randint(k3, (bs, S - 3), 3, 20, dtype=jnp.int32)
    r_tail = r_tail.at[:, 0].set(c_tail[:, 0] + 1)     # force divergence at pos 3
    chosen = jnp.concatenate([prompt, c_tail], axis=1).at[:, -1].set(EOS_ID)
    rejected = jnp.concatenate([prompt, r_tail], axis=1).at[:, -1].set(EOS_ID)
    input_ids = jnp.concatenate([chosen, rejected], axis=0)    # (2*bs, S)

    # stand-in for the LoRA backbone's last hidden states
    hidden_states = jax.random.normal(k4, (B2, S, H), dtype=jnp.float32)

    # v_head = nn.Linear(H, 1, bias=False): uniform(-1/sqrt(H), 1/sqrt(H))
    limit = 1.0 / (H ** 0.5)
    w_v = jax.random.uniform(k5, (1, H), minval=-limit, maxval=limit,
                             dtype=jnp.float32)

    out = gpt_reward_model_lora_forward(input_ids, hidden_states, w_v)
    out = jax.block_until_ready(out)

    ref_loss, ref_ce, ref_re, ref_rewards = np_reference(input_ids, hidden_states, w_v)
    np.testing.assert_allclose(np.asarray(out["rewards"]), ref_rewards,
                               rtol=1e-4, atol=1e-5)
    np.testing.assert_allclose(float(out["loss"]), ref_loss, rtol=1e-4, atol=1e-5)
    np.testing.assert_allclose(np.asarray(out["chosen_end_scores"]), ref_ce,
                               rtol=1e-4, atol=1e-5)
    np.testing.assert_allclose(np.asarray(out["rejected_end_scores"]), ref_re,
                               rtol=1e-4, atol=1e-5)

    print("KERNEL_OK")
</pallas_src>

<mosaic_0001>
module attributes {stable_mosaic.version = 11 : i64} {
  func.func @_vhead_kernel(%arg0: i32, %arg1: i32, %arg2: memref<4x8x32xbf16, #tpu.memory_space<vmem>>, %arg3: memref<1x1x32xbf16, #tpu.memory_space<vmem>>, %arg4: memref<4x8xf32, #tpu.memory_space<vmem>>) attributes {dimension_semantics = [#tpu.dimension_semantics<parallel>, #tpu.dimension_semantics<parallel>], iteration_bounds = array<i64: 1, 1>, scalar_prefetch = 0 : i64, scratch_operands = 0 : i64, tpu.core_type = #tpu.core_type<tc>, window_params = [{transform_indices = @transform_0, window_bounds = array<i64: 4, 8, 32>}, {pipeline_mode = #tpu.pipeline_mode<synchronous>, transform_indices = @transform_1, window_bounds = array<i64: 1, 1, 32>}, {transform_indices = @transform_2, window_bounds = array<i64: 4, 8>}]} {
    %c0 = arith.constant 0 : index
    %c0_0 = arith.constant 0 : index
    %c0_1 = arith.constant 0 : index
    %0 = vector.load %arg2[%c0, %c0_0, %c0_1] : memref<4x8x32xbf16, #tpu.memory_space<vmem>>, vector<4x8x32xbf16>
    %1 = arith.extf %0 : vector<4x8x32xbf16> to vector<4x8x32xf32>
    %c0_2 = arith.constant 0 : index
    %c0_3 = arith.constant 0 : index
    %c0_4 = arith.constant 0 : index
    %2 = vector.load %arg3[%c0_2, %c0_3, %c0_4] : memref<1x1x32xbf16, #tpu.memory_space<vmem>>, vector<1x1x32xbf16>
    %3 = arith.extf %2 : vector<1x1x32xbf16> to vector<1x1x32xf32>
    %4 = vector.broadcast %3 : vector<1x1x32xf32> to vector<4x8x32xf32>
    %5 = arith.mulf %1, %4 : vector<4x8x32xf32>
    %cst = arith.constant dense<0.000000e+00> : vector<4x8xf32>
    %6 = vector.multi_reduction <add>, %5, %cst [2] : vector<4x8x32xf32> to vector<4x8xf32>
    %c0_5 = arith.constant 0 : index
    %c0_6 = arith.constant 0 : index
    %7 = vector.load %arg4[%c0_5, %c0_6] : memref<4x8xf32, #tpu.memory_space<vmem>>, vector<4x8xf32>
    tpu.vector_store %arg4[%c0_5, %c0_6], %6 {strides = array<i32>} : memref<4x8xf32, #tpu.memory_space<vmem>>, vector<4x8xf32>,
    return
  }
  func.func @transform_0(%arg0: i32, %arg1: i32) -> (i32, i32, i32) {
    %c0_i32 = arith.constant 0 : i32
    %c0_i32_0 = arith.constant 0 : i32
    return %arg0, %arg1, %c0_i32 : i32, i32, i32
  }
  func.func @transform_1(%arg0: i32, %arg1: i32) -> (i32, i32, i32) {
    %c0_i32 = arith.constant 0 : i32
    %c0_i32_0 = arith.constant 0 : i32
    %c0_i32_1 = arith.constant 0 : i32
    %c0_i32_2 = arith.constant 0 : i32
    return %c0_i32, %c0_i32_0, %c0_i32_1 : i32, i32, i32
  }
  func.func @transform_2(%arg0: i32, %arg1: i32) -> (i32, i32) {
    %c0_i32 = arith.constant 0 : i32
    return %arg0, %arg1 : i32, i32
  }
}

</mosaic_0001>

<bundles_post_ra>
// kernel: tpu_custom_call.1
= control target key start
LH: loop header
LB: loop body
LE: loop exit
PB: predicated region body
PF: predicated region fallthrough
CT: control target
= control target key end

     0   :  { %7 = vsyncpa [#allocation3], 0  ;;  %s210_s0 = inlined_call_operand.hbm [shape: bf16[4,8,32], index: 0, kind: input, shape index: {}]   ;;  %s211_s1 = inlined_call_operand.vmem [shape: bf16[1,1,32], index: 1, kind: input, shape index: {}]   ;;  %s212_s2 = inlined_call_operand.hbm [shape: f32[4,8], index: 2, kind: output, shape index: {}]  }
   0x1   :  { %8 = vsyncpa [#allocation4], 0  ;;  %s164_s9 = smov [#allocation2]   ;;  %s116_s13 = scalar_lea.hbm %s210_s0, 256 }
   0x2   :  { %s14_s10 = sshll.u32 %s164_s9, 4  ;;  %p117_p0 = scmp.ne.s32.totalorder %s210_s0, %s116_s13  ;;  %s15_s10 = int_to_ptr.vmem [resolvable:$true] %s14_s10 }
   0x3   :  { %p120_p1 = scmp.lt.u32.totalorder %s116_s13, %s210_s0 }
   0x5   :  { %p122_p2 = pnand %p120_p1, %p117_p0 }
   0x7   :  { %125 = shalt.err (!%p122_p2)
}
   0x8   :  { %s126_s18 = scalar_lea.vmem %s15_s10, 256  ;;  %p131_p4 = scmp.lt.s32.totalorder %s15_s10, %s15_s10 }
   0x9   :  { %p127_p3 = scmp.ne.s32.totalorder %s15_s10, %s126_s18  ;;  %p132_p5 = scmp.lt.s32.totalorder %s126_s18, %s126_s18 }
   0xb   :  { %p133_p6 = por %p132_p5, %p131_p4 }
   0xd   :  { %p134_p7 = pnand %p133_p6, %p127_p3 }
   0xf   :  { %137 = shalt.err (!%p134_p7)
}
  0x10   :  { %s165_s19 = smov 64   ;;  %s166_s20 = smov 4  }
  0x11   :  { %20 = dma.hbm_to_vmem [thread:$0]  %s210_s0, 256, %s15_s10, [#allocation3], %s165_s19, %s165_s19, %s166_s20  }
  0x12   :  { %160 = dma.done.wait [#allocation3], 256  }
  0x13   :  { %161 = vsyncadd [#allocation3], 4294967040  ;;  %v36_v0 = vlaneseq  ;;  %v104_v5 = vld [vmem:[#allocation2] sm:$0xff]   ;;  %v111_v7 = vld [vmem:[#allocation2 + $0x8] sm:$0xff]   ;;  %vm44_vm0 = vcmask 261120   ;;  %vm79_vm1 = vcmask 1041409  }
  0x14   :  { %v34_v6 = vld [vmem:[%s211_s1] sm:$0x1]  ;;  %v105_v8 = vunpack.c.l.bf16 %v104_v5  ;;  %v109_v10 = vunpack.c.l.bf16 %v111_v7  ;;  %v106_v11 = vunpack.c.h.bf16 %v104_v5  ;;  %v110_v12 = vunpack.c.h.bf16 %v111_v7  ;;  %s167_s0 = smov [#allocation5]  }
  0x15   :  { %v37_v1 = vshrl.u32 %v36_v0, 7  ;;  %v62_v2 = vand.u32 127, %v36_v0  ;;  %v35_v9 = vunpack.c.l.bf16 %v34_v6  ;;  %vm81_vm2 = vcmask 1042434   ;;  %s94_s1 = sshll.u32 %s167_s0, 4  ;;  %s95_s1 = int_to_ptr.vmem [resolvable:$true] %s94_s1 }
  0x16   :  { %vm83_vm3 = vcmask 1043459   ;;  %vm86_vm4 = vcmask 60416   ;;  %s138_s25 = scalar_lea.vmem %s95_s1, 64  ;;  %p143_p9 = scmp.lt.s32.totalorder %s95_s1, %s95_s1 }
  0x17   :  { %v65_v3 = vsub.s32 %v62_v2, %v37_v1  ;;  %v38_v4 = vsub.s32 0, %v37_v1  ;;  %p139_p8 = scmp.ne.s32.totalorder %s95_s1, %s138_s25  ;;  %p144_p10 = scmp.lt.s32.totalorder %s138_s25, %s138_s25 }
  0x19   :  { %v39_v13 = vrot.slane %v35_v9, %v38_v4  ;;  %p145_p11 = por %p144_p10, %p143_p9 }
  0x1b   :  { %v40_v14 = vmul.f32 %v105_v8, %v39_v13  ;;  %v42_v15 = vmul.f32 %v109_v10, %v39_v13  ;;  %v41_v16 = vmul.f32 %v106_v11, %v39_v13  ;;  %v43_v17 = vmul.f32 %v110_v12, %v39_v13  ;;  %p146_p12 = pnand %p145_p11, %p139_p8 }
  0x1d   :  { %v45_v18 = vsel %vm44_vm0, %v40_v14, 0.0  ;;  %v51_v19 = vsel %vm44_vm0, %v42_v15, 0.0  ;;  %v48_v20 = vsel %vm44_vm0, %v41_v16, 0.0  ;;  %v54_v21 = vsel %vm44_vm0, %v43_v17, 0.0 }
  0x1e   :  { %46 = vadd.xlane.f32.xlu0 %v45_v18  ;;  %52 = vadd.xlane.f32.xlu1 %v51_v19 }
  0x22   :  { %49 = vadd.xlane.f32.xlu0 %v48_v20  ;;  %55 = vadd.xlane.f32.xlu1 %v54_v21 }
  0xab   :  { %v47_v22 = vpop.xlane.xlu0 %46  ;;  %v53_v23 = vpop.xlane.xlu1 %52 }
  0xac   :  { %v66_v26 = vrot.slane %v47_v22, %v65_v3  ;;  %v74_v29 = vrot.slane %v53_v23, %v65_v3 }
  0xaf   :  { %v50_v24 = vpop.xlane.xlu0 %49  ;;  %v56_v25 = vpop.xlane.xlu1 %55 }
  0xb0   :  { %v70_v27 = vrot.slane %v50_v24, %v65_v3  ;;  %v78_v28 = vrot.slane %v56_v25, %v65_v3 }
  0xb2   :  { %v80_v30 = vsel %vm79_vm1, %v70_v27, %v66_v26 }
  0xb3   :  { %v82_v31 = vsel %vm81_vm2, %v74_v29, %v80_v30 }
  0xb4   :  { %v84_v32 = vsel %vm83_vm3, %v78_v28, %v82_v31 }
  0xb5   :  { %87 = vst.msk [vmem:[#allocation5] sm:$0xf] %vm86_vm4, %v84_v32 }
  0xb6   :  { %149 = shalt.err (!%p146_p12)
}
  0xb7   :  { %s150_s28 = scalar_lea.hbm %s212_s2, 64 }
  0xb8   :  { %p151_p13 = scmp.ne.s32.totalorder %s212_s2, %s150_s28  ;;  %p154_p0 = scmp.lt.u32.totalorder %s150_s28, %s212_s2 }
  0xba   :  { %p156_p1 = pnand %p154_p0, %p151_p13 }
  0xbc   :  { %159 = shalt.err (!%p156_p1)
}
  0xbd   :  { %97 = dma.vmem_to_hbm [thread:$0]  %s95_s1, 64, %s212_s2, [#allocation4]  }
  0xbe   :  { %162 = dma.done.wait [#allocation4], 64  }
  0xbf   :  { %163 = vsyncadd [#allocation4], 4294967232 }
  0xc0   :  { %101 = vsyncpa [#allocation3], 1 }
  0xc1   :  { %102 = vsyncpa [#allocation4], 1 }

</bundles_post_ra>
